<compile_context>
chip_gen: v7x
topology: tpu7x:2x2x1
jax: 0.10.0
libtpu: 0.0.40
codegen_flags: <defaults>
</compile_context>

<pallas_src>
import functools

import jax
import jax.numpy as jnp
from jax.experimental import pallas as pl
from jax.experimental.pallas import tpu as pltpu


def _round_up(x, m):
    return ((x + m - 1) // m) * m


def _default_tile_m():
    # v4/v5-generation MXU passes are 128 rows wide; v6e / v7x are 256 wide.
    try:
        kind = jax.devices()[0].device_kind.lower()
    except Exception:
        kind = ""
    if "v4" in kind or "v5" in kind:
        return 128
    return 256


def _mwm_embedding_kernel(char_ref, pad_ref, pos_ref, table_ref, seed_ref,
                          out_ref, *, vocab_size, dropout, training):
    tm = out_ref.shape[0]
    K, D = table_ref.shape  # K = vocab_size + 3 + seq_len

    # One-hot with the fused-table axis K on lanes: shape (TM, K).
    # Column layout: [0, V) char rows | [V, V+3) pad rows | [V+3, K) pos rows.
    # The three hit-sets are disjoint, so OR == sum, and ONE MXU matmul yields
    # chars_embd + pad_embd + pos_embd.
    #
    # NOTE: out-of-range / negative ids silently select a wrong (or zero) row
    # here, whereas torch.nn.Embedding would raise an error.
    col = jax.lax.broadcasted_iota(jnp.int32, (tm, K), 1)
    one_hot = ((col == char_ref[...])
               | (col == (pad_ref[...] + vocab_size))
               | (col == (pos_ref[...] + (vocab_size + 3)))).astype(jnp.float32)

    embd = jax.lax.dot_general(
        one_hot, table_ref[...],
        dimension_numbers=(((1,), (0,)), ((), ())),
        preferred_element_type=jnp.float32)                      # (TM, D)

    # F.dropout(embd, p=dropout, training=training): keep-mask + 1/(1-p) scale.
    if training and 0.0 < dropout < 1.0:
        pltpu.prng_seed(seed_ref[0] + pl.program_id(0))
        bits = pltpu.bitcast(pltpu.prng_random_bits((tm, D)), jnp.int32)
        bits = bits & 0x7FFFFFFF                   # uniform int32 in [0, 2^31)
        threshold = jnp.int32(min(int(round(dropout * 2147483648.0)),
                                  2147483647))
        keep = bits >= threshold                   # P(keep) = 1 - p
        # TODO(synk): uses the TPU hardware PRNG stream; semantics match
        # F.dropout but it is not bitwise identical to torch's RNG.
        embd = jnp.where(keep, embd * (1.0 / (1.0 - dropout)), 0.0)

    out_ref[...] = embd.astype(out_ref.dtype)


def mwm_embedding(char_ids, pad_ids, emb_table, pad_table, pos_table,
                  *, dropout=0.12, training=False, seed=0, tile_m=None):
    """Pallas implementation of MWMEmbedding.forward."""
    assert char_ids.shape == pad_ids.shape
    B, S = char_ids.shape
    V, D = emb_table.shape
    assert pad_table.shape == (3, D)
    assert pos_table.shape[0] >= S and pos_table.shape[1] == D

    if training and dropout >= 1.0:
        # F.dropout with p >= 1 zeroes everything (1/(1-p) is undefined).
        return jnp.zeros((B, S, D), jnp.float32)

    tm = tile_m if tile_m is not None else _default_tile_m()
    bs = B * S
    tm = min(tm, _round_up(bs, 128))          # don't over-pad tiny problems
    bs_pad = _round_up(bs, tm)
    n_tiles = bs_pad // tm

    # Fused lookup table: char rows | pad rows | pos rows 0..S-1 (the pos slice
    # is folded into this concat instead of a separate wrapper-side slice).
    # For a realistic vocab, precompute this concat once per model instance.
    table = jnp.concatenate(
        [emb_table.astype(jnp.float32),
         pad_table.astype(jnp.float32),
         pos_table[:S].astype(jnp.float32)], axis=0)              # (V+3+S, D)
    K = V + 3 + S

    # Flatten ids onto one token axis; positional id of flat token t is t % S.
    flat_char = char_ids.reshape(-1).astype(jnp.int32)
    flat_pad = pad_ids.reshape(-1).astype(jnp.int32)
    if bs_pad != bs:
        flat_char = jnp.pad(flat_char, (0, bs_pad - bs))
        flat_pad = jnp.pad(flat_pad, (0, bs_pad - bs))
    flat_pos = jnp.arange(bs_pad, dtype=jnp.int32) % S

    char_col = flat_char.reshape(bs_pad, 1)
    pad_col = flat_pad.reshape(bs_pad, 1)
    pos_col = flat_pos.reshape(bs_pad, 1)
    seed_arr = jnp.array([seed], dtype=jnp.int32)

    kernel = functools.partial(_mwm_embedding_kernel,
                               vocab_size=V,
                               dropout=float(dropout),
                               training=bool(training))

    # TODO(synk): for large vocabularies, single-buffer the invariant table
    # (pipeline_mode=pl.Buffered(1)) and/or replace the one-hot matmul with a
    # scalar-prefetch-driven DMA row gather to stay within v7x's 64 MiB VMEM.
    out_flat = pl.pallas_call(
        kernel,
        out_shape=jax.ShapeDtypeStruct((bs_pad, D), jnp.float32),
        grid=(n_tiles,),
        in_specs=[
            pl.BlockSpec((tm, 1), lambda i: (i, 0)),   # char ids (per tile)
            pl.BlockSpec((tm, 1), lambda i: (i, 0)),   # pad ids  (per tile)
            pl.BlockSpec((tm, 1), lambda i: (i, 0)),   # pos ids  (per tile)
            pl.BlockSpec((K, D), lambda i: (0, 0)),    # fused table (invariant)
            pl.BlockSpec(memory_space=pltpu.MemorySpace.SMEM),   # dropout seed
        ],
        out_specs=pl.BlockSpec((tm, D), lambda i: (i, 0)),
        compiler_params=pltpu.CompilerParams(
            dimension_semantics=("parallel",)),
    )(char_col, pad_col, pos_col, table, seed_arr)

    return out_flat[:bs].reshape(B, S, D)


if __name__ == "__main__":
    # Small, MXU/vreg-friendly shapes consistent with the module.
    vocab_size = 32
    pos_size = 16
    embedding_dim = 128
    batch = 2
    seq_len = 8

    key = jax.random.PRNGKey(0)
    k_emb, k_pad, k_pos, k_cid, k_pid = jax.random.split(key, 5)

    # nn.Embedding default init: N(0, 1)
    emb_table = jax.random.normal(k_emb, (vocab_size, embedding_dim), jnp.float32)
    pad_table = jax.random.normal(k_pad, (3, embedding_dim), jnp.float32)
    pos_table = jax.random.normal(k_pos, (pos_size, embedding_dim), jnp.float32)

    char_ids = jax.random.randint(k_cid, (batch, seq_len), 0, vocab_size, jnp.int32)
    pad_ids = jax.random.randint(k_pid, (batch, seq_len), 0, 3, jnp.int32)

    # Eval mode (training=False): dropout is identity, output is deterministic.
    out = mwm_embedding(char_ids, pad_ids, emb_table, pad_table, pos_table,
                        dropout=0.12, training=False)
    out = jax.block_until_ready(out)

    # Pure-JAX reference of the forward pass (eval mode).
    ref = (jnp.take(emb_table, char_ids, axis=0)
           + jnp.take(pad_table, pad_ids, axis=0)
           + pos_table[:seq_len][None, :, :])

    assert out.shape == (batch, seq_len, embedding_dim)
    assert jnp.allclose(out, ref, atol=1e-5, rtol=1e-5), "mismatch vs reference"

    print("KERNEL_OK")
</pallas_src>

<mosaic_0001>
module attributes {stable_mosaic.version = 11 : i64} {
  func.func @_mwm_embedding_kernel(%arg0: i32, %arg1: memref<128x1xi32, #tpu.memory_space<vmem>>, %arg2: memref<128x1xi32, #tpu.memory_space<vmem>>, %arg3: memref<128x1xi32, #tpu.memory_space<vmem>>, %arg4: memref<43x128xf32, #tpu.memory_space<vmem>>, %arg5: memref<1xi32, #tpu.memory_space<smem>>, %arg6: memref<128x128xf32, #tpu.memory_space<vmem>>) attributes {dimension_semantics = [#tpu.dimension_semantics<parallel>], iteration_bounds = array<i64: 1>, scalar_prefetch = 0 : i64, scratch_operands = 0 : i64, tpu.core_type = #tpu.core_type<tc>, window_params = [{transform_indices = @transform_0, window_bounds = array<i64: 128, 1>}, {transform_indices = @transform_1, window_bounds = array<i64: 128, 1>}, {transform_indices = @transform_2, window_bounds = array<i64: 128, 1>}, {pipeline_mode = #tpu.pipeline_mode<synchronous>, transform_indices = @transform_3, window_bounds = array<i64: 43, 128>}, {transform_indices = @transform_4, window_bounds = array<i64: 1>}, {transform_indices = @transform_5, window_bounds = array<i64: 128, 128>}]} {
    %0 = tpu.iota {dimensions = array<i32: 1>} : vector<128x43xi32>
    %c0 = arith.constant 0 : index
    %c0_0 = arith.constant 0 : index
    %1 = vector.load %arg1[%c0, %c0_0] : memref<128x1xi32, #tpu.memory_space<vmem>>, vector<128x1xi32>
    %2 = vector.broadcast %1 : vector<128x1xi32> to vector<128x43xi32>
    %3 = arith.cmpi eq, %0, %2 : vector<128x43xi32>
    %c0_1 = arith.constant 0 : index
    %c0_2 = arith.constant 0 : index
    %4 = vector.load %arg2[%c0_1, %c0_2] : memref<128x1xi32, #tpu.memory_space<vmem>>, vector<128x1xi32>
    %c32_i32 = arith.constant 32 : i32
    %5 = vector.broadcast %c32_i32 : i32 to vector<128x1xi32>
    %6 = arith.addi %4, %5 : vector<128x1xi32>
    %7 = vector.broadcast %6 : vector<128x1xi32> to vector<128x43xi32>
    %8 = arith.cmpi eq, %0, %7 : vector<128x43xi32>
    %9 = arith.ori %3, %8 : vector<128x43xi1>
    %c0_3 = arith.constant 0 : index
    %c0_4 = arith.constant 0 : index
    %10 = vector.load %arg3[%c0_3, %c0_4] : memref<128x1xi32, #tpu.memory_space<vmem>>, vector<128x1xi32>
    %c35_i32 = arith.constant 35 : i32
    %11 = vector.broadcast %c35_i32 : i32 to vector<128x1xi32>
    %12 = arith.addi %10, %11 : vector<128x1xi32>
    %13 = vector.broadcast %12 : vector<128x1xi32> to vector<128x43xi32>
    %14 = arith.cmpi eq, %0, %13 : vector<128x43xi32>
    %15 = arith.ori %9, %14 : vector<128x43xi1>
    %16 = arith.extui %15 : vector<128x43xi1> to vector<128x43xi32>
    %17 = arith.sitofp %16 : vector<128x43xi32> to vector<128x43xf32>
    %c0_5 = arith.constant 0 : index
    %c0_6 = arith.constant 0 : index
    %18 = vector.load %arg4[%c0_5, %c0_6] : memref<43x128xf32, #tpu.memory_space<vmem>>, vector<43x128xf32>
    %cst = arith.constant dense<0.000000e+00> : vector<128x128xf32>
    %19 = tpu.matmul %17, %18, %cst {dimension_numbers = #tpu.dot_dimension_numbers<[1], [0], [0], [1], [0, 0, 1, 1], [], []>} : vector<128x43xf32>, vector<43x128xf32>, vector<128x128xf32> -> vector<128x128xf32>
    %c0_7 = arith.constant 0 : index
    %c0_8 = arith.constant 0 : index
    %20 = vector.load %arg6[%c0_7, %c0_8] : memref<128x128xf32, #tpu.memory_space<vmem>>, vector<128x128xf32>
    tpu.vector_store %arg6[%c0_7, %c0_8], %19 {strides = array<i32>} : memref<128x128xf32, #tpu.memory_space<vmem>>, vector<128x128xf32>,
    return
  }
  func.func @transform_0(%arg0: i32) -> (i32, i32) {
    %c0_i32 = arith.constant 0 : i32
    %c0_i32_0 = arith.constant 0 : i32
    return %arg0, %c0_i32 : i32, i32
  }
  func.func @transform_1(%arg0: i32) -> (i32, i32) {
    %c0_i32 = arith.constant 0 : i32
    %c0_i32_0 = arith.constant 0 : i32
    return %arg0, %c0_i32 : i32, i32
  }
  func.func @transform_2(%arg0: i32) -> (i32, i32) {
    %c0_i32 = arith.constant 0 : i32
    %c0_i32_0 = arith.constant 0 : i32
    return %arg0, %c0_i32 : i32, i32
  }
  func.func @transform_3(%arg0: i32) -> (i32, i32) {
    %c0_i32 = arith.constant 0 : i32
    %c0_i32_0 = arith.constant 0 : i32
    %c0_i32_1 = arith.constant 0 : i32
    return %c0_i32, %c0_i32_0 : i32, i32
  }
  func.func @transform_4(%arg0: i32) -> i32 {
    %c0_i32 = arith.constant 0 : i32
    %c0_i32_0 = arith.constant 0 : i32
    return %c0_i32 : i32
  }
  func.func @transform_5(%arg0: i32) -> (i32, i32) {
    %c0_i32 = arith.constant 0 : i32
    %c0_i32_0 = arith.constant 0 : i32
    return %arg0, %c0_i32 : i32, i32
  }
}

</mosaic_0001>

<bundles_post_ra>
// kernel: tpu_custom_call.1
= control target key start
LH: loop header
LB: loop body
LE: loop exit
PB: predicated region body
PF: predicated region fallthrough
CT: control target
= control target key end

     0   :  { %v739_v2 = vmov 0   ;;  %s1031_s0 = inlined_call_operand.vmem [shape: s32[128,1], index: 0, kind: input, shape index: {}]   ;;  %s1032_s1 = inlined_call_operand.vmem [shape: s32[128,1], index: 1, kind: input, shape index: {}]   ;;  %s1033_s2 = inlined_call_operand.vmem [shape: s32[128,1], index: 2, kind: input, shape index: {}]   ;;  %s1034_s3 = inlined_call_operand.vmem [shape: f32[43,128], index: 3, kind: input, shape index: {}]   ;;  %s1035_s4 = inlined_call_operand.<no memory space> [shape: s32[1], index: 4, kind: input, shape index: {}]   ;;  %s1036_s5 = inlined_call_operand.hbm [shape: f32[128,128], index: 5, kind: output, shape index: {}]  }
   0x1   :  { %v24_v0 = vld [vmem:[%s1031_s0] sm:$0xff]  ;;  %713 = vset.pattern.permute.xlu0 %v739_v2  ;;  %714 = vset.pattern.permute.xlu1 %v739_v2  ;;  %v25_v7 = vld [vmem:[%s1031_s0 + $0x8] sm:$0xff]  ;;  %v362_v21 = vld [vmem:[%s1034_s3 + $0x10] sm:$0xff] }
   0x2   :  { %v104_v1 = vld [vmem:[%s1032_s1] sm:$0xff]  ;;  %41 = vperm.xlu0 %713, %v24_v0   ;;  %v105_v8 = vld [vmem:[%s1032_s1 + $0x8] sm:$0xff]  ;;  %v363_v23 = vld [vmem:[%s1034_s3 + $0x18] sm:$0xff] }
   0x3   :  { %v120_v3 = vadd.s32 32, %v104_v1  ;;  %v112_v4 = vld [vmem:[%s1032_s1 + $0x40] sm:$0xff]  ;;  %v33_v9 = vld [vmem:[%s1031_s0 + $0x48] sm:$0xff]  ;;  %v121_v11 = vadd.s32 32, %v105_v8 }
   0x4   :  { %v32_v5 = vld [vmem:[%s1031_s0 + $0x40] sm:$0xff]  ;;  %v128_v6 = vadd.s32 32, %v112_v4  ;;  %v113_v10 = vld [vmem:[%s1032_s1 + $0x48] sm:$0xff] }
   0x5   :  { %137 = vperm.xlu1 %714, %v120_v3   ;;  %v129_v12 = vadd.s32 32, %v113_v10  ;;  %v216_v13 = vld [vmem:[%s1033_s2] sm:$0xff]  ;;  %v217_v17 = vld [vmem:[%s1033_s2 + $0x8] sm:$0xff] }
   0x6   :  { %65 = vperm.xlu0 %713, %v32_v5   ;;  %v224_v14 = vld [vmem:[%s1033_s2 + $0x40] sm:$0xff]  ;;  %v232_v15 = vadd.s32 35, %v216_v13  ;;  %v225_v18 = vld [vmem:[%s1033_s2 + $0x48] sm:$0xff] }
   0x7   :  { %v240_v16 = vadd.s32 35, %v224_v14  ;;  %v360_v19 = vld [vmem:[%s1034_s3] sm:$0xff]  ;;  %v361_v20 = vld [vmem:[%s1034_s3 + $0x8] sm:$0xff] }
   0x8   :  { %v687_v22 = vpack.c.bf16 %v361_v20, %v360_v19 }
   0x9   :  { %161 = vperm.xlu1 %714, %v128_v6  }
   0xa   :  { %44 = vperm.xlu0 %713, %v25_v7  }
   0xd   :  { %68 = vperm.xlu1 %714, %v33_v9  }
   0xe   :  { %140 = vperm.xlu0 %713, %v121_v11  }
  0x11   :  { %164 = vperm.xlu1 %714, %v129_v12  }
  0x12   :  { %11 = vsyncpa [#allocation4], 0  ;;  %249 = vperm.xlu0 %713, %v232_v15   ;;  %v233_v24 = vadd.s32 35, %v217_v17  ;;  %v691_v25 = vpack.c.bf16 %v363_v23, %v362_v21  ;;  %v364_v26 = vld [vmem:[%s1034_s3 + $0x20] sm:$0xff]  ;;  %v365_v27 = vld [vmem:[%s1034_s3 + $0x28] sm:$0x7]  ;;  %688 = vmatprep.subr.bf16.mxu0 %v687_v22 }
  0x13   :  { %v241_v28 = vadd.s32 35, %v225_v18  ;;  %vm415_vm0 = vcmask 1042432   ;;  %701 = vmatprep.subr.bf16.mxu1 %v687_v22  ;;  %690 = vmatpush3.bf16.msra.mxu0 %v687_v22  ;;  %v695_v29 = vpack.c.bf16 %v365_v27, %v364_v26  ;;  %vm740_vm1 = vmmov 1   ;;  %v26_v30 = vld [vmem:[%s1031_s0 + $0x10] sm:$0xff]  ;;  %v27_v36 = vld [vmem:[%s1031_s0 + $0x18] sm:$0xff]  ;;  %v28_v50 = vld [vmem:[%s1031_s0 + $0x20] sm:$0xff] }
  0x14   :  { %704 = vmatpush3.bf16.msra.mxu1 %v687_v22  ;;  %692 = vmatprep.subr.bf16.mxu0 %v691_v25  ;;  %vm696_vm2 = vmpackc.low %vm415_vm0, %vm740_vm1  ;;  %v106_v31 = vld [vmem:[%s1032_s1 + $0x10] sm:$0xff]  ;;  %v107_v37 = vld [vmem:[%s1032_s1 + $0x18] sm:$0xff]  ;;  %vm366_vm11 = vcmask 351232  }
  0x15   :  { %273 = vperm.xlu1 %714, %v240_v16   ;;  %702 = vmatprep.subr.bf16.mxu1 %v691_v25  ;;  %v34_v32 = vld [vmem:[%s1031_s0 + $0x50] sm:$0xff]  ;;  %v122_v34 = vadd.s32 32, %v106_v31  ;;  %v35_v38 = vld [vmem:[%s1031_s0 + $0x58] sm:$0xff]  ;;  %v123_v40 = vadd.s32 32, %v107_v37  ;;  %v108_v51 = vld [vmem:[%s1032_s1 + $0x20] sm:$0xff] }
  0x16   :  { %252 = vperm.xlu0 %713, %v233_v24   ;;  %v114_v33 = vld [vmem:[%s1032_s1 + $0x50] sm:$0xff]  ;;  %v115_v39 = vld [vmem:[%s1032_s1 + $0x58] sm:$0xff]  ;;  %v36_v52 = vld [vmem:[%s1031_s0 + $0x60] sm:$0xff]  ;;  %v124_v54 = vadd.s32 32, %v108_v51 }
  0x17   :  { %694 = vmatpush3.bf16.msra.mxu0 %v691_v25  ;;  %v130_v35 = vadd.s32 32, %v114_v33  ;;  %v131_v41 = vadd.s32 32, %v115_v39  ;;  %v218_v42 = vld [vmem:[%s1033_s2 + $0x10] sm:$0xff]  ;;  %v219_v46 = vld [vmem:[%s1033_s2 + $0x18] sm:$0xff]  ;;  %v116_v53 = vld [vmem:[%s1032_s1 + $0x60] sm:$0xff] }
  0x18   :  { %705 = vmatpush3.bf16.msra.mxu1 %v691_v25  ;;  %697 = vmatprep.subr.msk.bf16.mxu0 %vm696_vm2, %v695_v29  ;;  %v226_v43 = vld [vmem:[%s1033_s2 + $0x50] sm:$0xff]  ;;  %v234_v44 = vadd.s32 35, %v218_v42  ;;  %v227_v47 = vld [vmem:[%s1033_s2 + $0x58] sm:$0xff]  ;;  %v235_v48 = vadd.s32 35, %v219_v46  ;;  %v132_v55 = vadd.s32 32, %v116_v53  ;;  %v29_v56 = vld [vmem:[%s1031_s0 + $0x28] sm:$0xff] }
  0x19   :  { %276 = vperm.xlu1 %714, %v241_v28   ;;  %703 = vmatprep.subr.msk.bf16.mxu1 %vm696_vm2, %v695_v29  ;;  %v242_v45 = vadd.s32 35, %v226_v43  ;;  %v243_v49 = vadd.s32 35, %v227_v47  ;;  %v109_v57 = vld [vmem:[%s1032_s1 + $0x28] sm:$0xff]  ;;  %v220_v62 = vld [vmem:[%s1033_s2 + $0x20] sm:$0xff]  ;;  %v30_v6 = vld [vmem:[%s1031_s0 + $0x30] sm:$0xff] }
  0x1a   :  { %47 = vperm.xlu0 %713, %v26_v30   ;;  %v37_v58 = vld [vmem:[%s1031_s0 + $0x68] sm:$0xff]  ;;  %v125_v60 = vadd.s32 32, %v109_v57  ;;  %v228_v63 = vld [vmem:[%s1033_s2 + $0x60] sm:$0xff]  ;;  %v236_v0 = vadd.s32 35, %v220_v62  ;;  %v110_v7 = vld [vmem:[%s1032_s1 + $0x30] sm:$0xff] }
  0x1b   :  { %700 = vmatpush3.bf16.msk.msra.mxu0 %vm696_vm2, %v695_v29  ;;  %v117_v59 = vld [vmem:[%s1032_s1 + $0x68] sm:$0xff]  ;;  %v244_v1 = vadd.s32 35, %v228_v63  ;;  %v38_v8 = vld [vmem:[%s1031_s0 + $0x70] sm:$0xff]  ;;  %v126_v10 = vadd.s32 32, %v110_v7  ;;  %v31_v12 = vld [vmem:[%s1031_s0 + $0x38] sm:$0xff] }
  0x1c   :  { %706 = vmatpush3.bf16.msk.msra.mxu1 %vm696_vm2, %v695_v29  ;;  %v133_v61 = vadd.s32 32, %v117_v59  ;;  %v221_v2 = vld [vmem:[%s1033_s2 + $0x28] sm:$0xff]  ;;  %v118_v9 = vld [vmem:[%s1032_s1 + $0x70] sm:$0xff]  ;;  %v111_v13 = vld [vmem:[%s1032_s1 + $0x38] sm:$0xff]  ;;  %v22_v29 = vlaneseq }
  0x1d   :  { %71 = vperm.xlu1 %714, %v34_v32   ;;  %v229_v3 = vld [vmem:[%s1033_s2 + $0x68] sm:$0xff]  ;;  %v237_v4 = vadd.s32 35, %v221_v2  ;;  %v134_v11 = vadd.s32 32, %v118_v9  ;;  %v39_v14 = vld [vmem:[%s1031_s0 + $0x78] sm:$0xff]  ;;  %v127_v16 = vadd.s32 32, %v111_v13  ;;  %v222_v18 = vld [vmem:[%s1033_s2 + $0x30] sm:$0xff] }
  0x1e   :  { %143 = vperm.xlu0 %713, %v122_v34   ;;  %v245_v5 = vadd.s32 35, %v229_v3  ;;  %v119_v15 = vld [vmem:[%s1032_s1 + $0x78] sm:$0xff]  ;;  %v230_v19 = vld [vmem:[%s1033_s2 + $0x70] sm:$0xff]  ;;  %v238_v20 = vadd.s32 35, %v222_v18  ;;  %v937_v32 = vand.u32 127, %v22_v29 }
  0x1f   :  { %v135_v17 = vadd.s32 32, %v119_v15  ;;  %v246_v21 = vadd.s32 35, %v230_v19  ;;  %v223_v22 = vld [vmem:[%s1033_s2 + $0x38] sm:$0xff] }
  0x20   :  { %v231_v23 = vld [vmem:[%s1033_s2 + $0x78] sm:$0xff]  ;;  %v239_v24 = vadd.s32 35, %v223_v22  ;;  %s742_s2 = smov [#allocation3]  }
  0x21   :  { %167 = vperm.xlu1 %714, %v130_v35   ;;  %v247_v25 = vadd.s32 35, %v231_v23  ;;  %s585_s17 = sshll.u32 %s742_s2, 4  ;;  %s586_s17 = int_to_ptr.vmem [resolvable:$true] %s585_s17 }
  0x22   :  { %50 = vperm.xlu0 %713, %v27_v36   ;;  %s715_s18 = scalar_lea.vmem %s586_s17, 2048  ;;  %p720_p1 = scmp.lt.s32.totalorder %s586_s17, %s586_s17 }
  0x23   :  { %p716_p0 = scmp.ne.s32.totalorder %s586_s17, %s715_s18  ;;  %p721_p2 = scmp.lt.s32.totalorder %s715_s18, %s715_s18 }
  0x25   :  { %74 = vperm.xlu1 %714, %v35_v38   ;;  %v741_v38 = vmov 0.0   ;;  %p722_p3 = por %p721_p2, %p720_p1 }
  0x26   :  { %146 = vperm.xlu0 %713, %v123_v40  }
  0x27   :  { %p723_p4 = pnand %p722_p3, %p716_p0 }
  0x29   :  { %170 = vperm.xlu1 %714, %v131_v41  }
  0x2a   :  { %255 = vperm.xlu0 %713, %v234_v44  }
  0x2d   :  { %279 = vperm.xlu1 %714, %v242_v45  }
  0x2e   :  { %258 = vperm.xlu0 %713, %v235_v48  }
  0x31   :  { %282 = vperm.xlu1 %714, %v243_v49  }
  0x32   :  { %53 = vperm.xlu0 %713, %v28_v50  }
  0x35   :  { %77 = vperm.xlu1 %714, %v36_v52  }
  0x36   :  { %149 = vperm.xlu0 %713, %v124_v54  }
  0x39   :  { %173 = vperm.xlu1 %714, %v132_v55  }
  0x3a   :  { %56 = vperm.xlu0 %713, %v29_v56  }
  0x3d   :  { %80 = vperm.xlu1 %714, %v37_v58  }
  0x3e   :  { %152 = vperm.xlu0 %713, %v125_v60  }
  0x41   :  { %176 = vperm.xlu1 %714, %v133_v61  }
  0x42   :  { %261 = vperm.xlu0 %713, %v236_v0  }
  0x45   :  { %285 = vperm.xlu1 %714, %v244_v1  }
  0x46   :  { %264 = vperm.xlu0 %713, %v237_v4  }
  0x49   :  { %288 = vperm.xlu1 %714, %v245_v5  }
  0x4a   :  { %59 = vperm.xlu0 %713, %v30_v6  }
  0x4d   :  { %83 = vperm.xlu1 %714, %v38_v8  }
  0x4e   :  { %155 = vperm.xlu0 %713, %v126_v10  }
  0x51   :  { %179 = vperm.xlu1 %714, %v134_v11  }
  0x52   :  { %62 = vperm.xlu0 %713, %v31_v12  }
  0x55   :  { %86 = vperm.xlu1 %714, %v39_v14  }
  0x56   :  { %158 = vperm.xlu0 %713, %v127_v16  }
  0x59   :  { %182 = vperm.xlu1 %714, %v135_v17  }
  0x5a   :  { %267 = vperm.xlu0 %713, %v238_v20  }
  0x5d   :  { %291 = vperm.xlu1 %714, %v246_v21  }
  0x5e   :  { %270 = vperm.xlu0 %713, %v239_v24  }
  0x61   :  { %294 = vperm.xlu1 %714, %v247_v25  }
  0x81   :  { %v42_v26 = vpop.permute.xlu0 %41 }
  0x82   :  { %vm88_vm3 = vcmp.eq.s32.totalorder %v937_v32, %v42_v26 }
  0x84   :  { %v138_v27 = vpop.permute.xlu1 %137 }
  0x85   :  { %v66_v28 = vpop.permute.xlu0 %65  ;;  %vm184_vm4 = vcmp.eq.s32.totalorder %v937_v32, %v138_v27 }
  0x86   :  { %vm96_vm5 = vcmp.eq.s32.totalorder %v937_v32, %v66_v28  ;;  %vm200_vm7 = vmor %vm88_vm3, %vm184_vm4 }
  0x88   :  { %v162_v30 = vpop.permute.xlu1 %161 }
  0x89   :  { %v45_v31 = vpop.permute.xlu0 %44  ;;  %vm192_vm6 = vcmp.eq.s32.totalorder %v937_v32, %v162_v30 }
  0x8a   :  { %vm208_vm8 = vmor %vm96_vm5, %vm192_vm6  ;;  %vm89_vm15 = vcmp.eq.s32.totalorder %v937_v32, %v45_v31 }
  0x8c   :  { %v69_v33 = vpop.permute.xlu1 %68 }
  0x8d   :  { %v141_v34 = vpop.permute.xlu0 %140  ;;  %vm97_vm1 = vcmp.eq.s32.totalorder %v937_v32, %v69_v33 }
  0x8e   :  { %vm185_vm9 = vcmp.eq.s32.totalorder %v937_v32, %v141_v34 }
  0x8f   :  { %vm201_vm2 = vmor %vm89_vm15, %vm185_vm9 }
  0x90   :  { %v165_v35 = vpop.permute.xlu1 %164 }
  0x91   :  { %v250_v36 = vpop.permute.xlu0 %249  ;;  %vm193_vm12 = vcmp.eq.s32.totalorder %v937_v32, %v165_v35 }
  0x92   :  { %vm296_vm10 = vcmp.eq.s32.totalorder %v937_v32, %v250_v36  ;;  %vm209_vm3 = vmor %vm97_vm1, %vm193_vm12 }
  0x93   :  { %vm312_vm14 = vmor %vm200_vm7, %vm296_vm10 }
  0x94   :  { %v274_v37 = vpop.permute.xlu1 %273  ;;  %v596_v39 = vsel %vm312_vm14, 1.0, %v741_v38 }
  0x95   :  { %vm304_vm13 = vcmp.eq.s32.totalorder %v937_v32, %v274_v37  ;;  %v253_v40 = vpop.permute.xlu0 %252  ;;  %663 = vmatprep.mubr.msk.f32.mxu0 %vm366_vm11, %v596_v39 }
  0x96   :  { %vm320_vm0 = vmor %vm208_vm8, %vm304_vm13  ;;  %vm297_vm4 = vcmp.eq.s32.totalorder %v937_v32, %v253_v40 }
  0x97   :  { %v604_v41 = vsel %vm320_vm0, 1.0, %v741_v38  ;;  %vm313_vm5 = vmor %vm201_vm2, %vm297_vm4 }
  0x98   :  { %v277_v42 = vpop.permute.xlu1 %276  ;;  %675 = vmatprep.mubr.msk.f32.mxu1 %vm366_vm11, %v604_v41  ;;  %v597_v43 = vsel %vm313_vm5, 1.0, %v741_v38 }
  0x99   :  { %vm305_vm6 = vcmp.eq.s32.totalorder %v937_v32, %v277_v42  ;;  %v48_v45 = vpop.permute.xlu0 %47  ;;  %664 = vmatmul.mubr.msk.f32.vlgmr.msra.gmra.mrb[0].mxu0 %vm366_vm11, %v597_v43 }
  0x9a   :  { %vm321_vm7 = vmor %vm209_vm3, %vm305_vm6  ;;  %vm90_vm10 = vcmp.eq.s32.totalorder %v937_v32, %v48_v45 }
  0x9b   :  { %v605_v44 = vsel %vm321_vm7, 1.0, %v741_v38 }
  0x9c   :  { %v72_v46 = vpop.permute.xlu1 %71  ;;  %676 = vmatmul.mubr.msk.f32.vlgmr.msra.gmra.mrb[0].mxu1 %vm366_vm11, %v605_v44 }
  0x9d   :  { %v144_v47 = vpop.permute.xlu0 %143  ;;  %vm98_vm12 = vcmp.eq.s32.totalorder %v937_v32, %v72_v46 }
  0x9e   :  { %vm186_vm8 = vcmp.eq.s32.totalorder %v937_v32, %v144_v47 }
  0x9f   :  { %vm202_vm13 = vmor %vm90_vm10, %vm186_vm8 }
  0xa0   :  { %v168_v48 = vpop.permute.xlu1 %167 }
  0xa1   :  { %v51_v49 = vpop.permute.xlu0 %50  ;;  %vm194_vm9 = vcmp.eq.s32.totalorder %v937_v32, %v168_v48 }
  0xa2   :  { %vm210_vm14 = vmor %vm98_vm12, %vm194_vm9  ;;  %vm91_vm4 = vcmp.eq.s32.totalorder %v937_v32, %v51_v49 }
  0xa4   :  { %v75_v50 = vpop.permute.xlu1 %74 }
  0xa5   :  { %v147_v51 = vpop.permute.xlu0 %146  ;;  %vm99_vm6 = vcmp.eq.s32.totalorder %v937_v32, %v75_v50 }
  0xa6   :  { %vm187_vm15 = vcmp.eq.s32.totalorder %v937_v32, %v147_v51 }
  0xa7   :  { %vm203_vm7 = vmor %vm91_vm4, %vm187_vm15 }
  0xa8   :  { %v171_v52 = vpop.permute.xlu1 %170 }
  0xa9   :  { %v256_v53 = vpop.permute.xlu0 %255  ;;  %vm195_vm1 = vcmp.eq.s32.totalorder %v937_v32, %v171_v52 }
  0xaa   :  { %vm298_vm0 = vcmp.eq.s32.totalorder %v937_v32, %v256_v53  ;;  %vm211_vm8 = vmor %vm99_vm6, %vm195_vm1 }
  0xab   :  { %vm314_vm2 = vmor %vm202_vm13, %vm298_vm0 }
  0xac   :  { %v280_v54 = vpop.permute.xlu1 %279  ;;  %v598_v55 = vsel %vm314_vm2, 1.0, %v741_v38 }
  0xad   :  { %vm306_vm3 = vcmp.eq.s32.totalorder %v937_v32, %v280_v54  ;;  %v259_v57 = vpop.permute.xlu0 %258  ;;  %666 = vmatprep.mubr.msk.f32.mxu0 %vm366_vm11, %v598_v55 }
  0xae   :  { %vm322_vm5 = vmor %vm210_vm14, %vm306_vm3  ;;  %vm299_vm9 = vcmp.eq.s32.totalorder %v937_v32, %v259_v57 }
  0xaf   :  { %v606_v56 = vsel %vm322_vm5, 1.0, %v741_v38  ;;  %vm315_vm10 = vmor %vm203_vm7, %vm299_vm9 }
  0xb0   :  { %v283_v58 = vpop.permute.xlu1 %282  ;;  %678 = vmatprep.mubr.msk.f32.mxu1 %vm366_vm11, %v606_v56  ;;  %v599_v59 = vsel %vm315_vm10, 1.0, %v741_v38 }
  0xb1   :  { %vm307_vm12 = vcmp.eq.s32.totalorder %v937_v32, %v283_v58  ;;  %v54_v61 = vpop.permute.xlu0 %53  ;;  %667 = vmatmul.mubr.msk.f32.gmra.mrb[2].mxu0 %vm366_vm11, %v599_v59 }
  0xb2   :  { %vm323_vm13 = vmor %vm211_vm8, %vm307_vm12  ;;  %vm92_vm0 = vcmp.eq.s32.totalorder %v937_v32, %v54_v61 }
  0xb3   :  { %v607_v60 = vsel %vm323_vm13, 1.0, %v741_v38 }
  0xb4   :  { %v78_v62 = vpop.permute.xlu1 %77  ;;  %679 = vmatmul.mubr.msk.f32.gmra.mrb[2].mxu1 %vm366_vm11, %v607_v60 }
  0xb5   :  { %v150_v63 = vpop.permute.xlu0 %149  ;;  %vm100_vm1 = vcmp.eq.s32.totalorder %v937_v32, %v78_v62 }
  0xb6   :  { %vm188_vm14 = vcmp.eq.s32.totalorder %v937_v32, %v150_v63 }
  0xb7   :  { %vm204_vm2 = vmor %vm92_vm0, %vm188_vm14 }
  0xb8   :  { %v174_v0 = vpop.permute.xlu1 %173 }
  0xb9   :  { %v57_v1 = vpop.permute.xlu0 %56  ;;  %vm196_vm15 = vcmp.eq.s32.totalorder %v937_v32, %v174_v0 }
  0xba   :  { %vm212_vm3 = vmor %vm100_vm1, %vm196_vm15  ;;  %vm93_vm9 = vcmp.eq.s32.totalorder %v937_v32, %v57_v1 }
  0xbc   :  { %v81_v2 = vpop.permute.xlu1 %80 }
  0xbd   :  { %v153_v3 = vpop.permute.xlu0 %152  ;;  %vm101_vm12 = vcmp.eq.s32.totalorder %v937_v32, %v81_v2 }
  0xbe   :  { %vm189_vm4 = vcmp.eq.s32.totalorder %v937_v32, %v153_v3 }
  0xbf   :  { %vm205_vm13 = vmor %vm93_vm9, %vm189_vm4 }
  0xc0   :  { %v177_v4 = vpop.permute.xlu1 %176 }
  0xc1   :  { %v262_v5 = vpop.permute.xlu0 %261  ;;  %vm197_vm6 = vcmp.eq.s32.totalorder %v937_v32, %v177_v4 }
  0xc2   :  { %vm300_vm5 = vcmp.eq.s32.totalorder %v937_v32, %v262_v5  ;;  %vm213_vm14 = vmor %vm101_vm12, %vm197_vm6 }
  0xc3   :  { %vm316_vm7 = vmor %vm204_vm2, %vm300_vm5 }
  0xc4   :  { %v286_v6 = vpop.permute.xlu1 %285  ;;  %v600_v7 = vsel %vm316_vm7, 1.0, %v741_v38 }
  0xc5   :  { %vm308_vm8 = vcmp.eq.s32.totalorder %v937_v32, %v286_v6  ;;  %v265_v9 = vpop.permute.xlu0 %264  ;;  %669 = vmatprep.mubr.msk.f32.mxu0 %vm366_vm11, %v600_v7 }
  0xc6   :  { %vm324_vm10 = vmor %vm212_vm3, %vm308_vm8  ;;  %vm301_vm15 = vcmp.eq.s32.totalorder %v937_v32, %v265_v9 }
  0xc7   :  { %v608_v8 = vsel %vm324_vm10, 1.0, %v741_v38  ;;  %vm317_vm0 = vmor %vm205_vm13, %vm301_vm15 }
  0xc8   :  { %v289_v10 = vpop.permute.xlu1 %288  ;;  %681 = vmatprep.mubr.msk.f32.mxu1 %vm366_vm11, %v608_v8  ;;  %v601_v11 = vsel %vm317_vm0, 1.0, %v741_v38 }
  0xc9   :  { %vm309_vm1 = vcmp.eq.s32.totalorder %v937_v32, %v289_v10  ;;  %v60_v13 = vpop.permute.xlu0 %59  ;;  %670 = vmatmul.mubr.msk.f32.gmra.mrb[4].mxu0 %vm366_vm11, %v601_v11 }
  0xca   :  { %vm325_vm2 = vmor %vm213_vm14, %vm309_vm1  ;;  %vm94_vm5 = vcmp.eq.s32.totalorder %v937_v32, %v60_v13 }
  0xcb   :  { %v609_v12 = vsel %vm325_vm2, 1.0, %v741_v38 }
  0xcc   :  { %v84_v14 = vpop.permute.xlu1 %83  ;;  %682 = vmatmul.mubr.msk.f32.gmra.mrb[4].mxu1 %vm366_vm11, %v609_v12 }
  0xcd   :  { %v156_v15 = vpop.permute.xlu0 %155  ;;  %vm102_vm6 = vcmp.eq.s32.totalorder %v937_v32, %v84_v14 }
  0xce   :  { %vm190_vm3 = vcmp.eq.s32.totalorder %v937_v32, %v156_v15 }
  0xcf   :  { %vm206_vm7 = vmor %vm94_vm5, %vm190_vm3 }
  0xd0   :  { %v180_v16 = vpop.permute.xlu1 %179 }
  0xd1   :  { %v63_v17 = vpop.permute.xlu0 %62  ;;  %vm198_vm4 = vcmp.eq.s32.totalorder %v937_v32, %v180_v16 }
  0xd2   :  { %vm214_vm8 = vmor %vm102_vm6, %vm198_vm4  ;;  %vm95_vm15 = vcmp.eq.s32.totalorder %v937_v32, %v63_v17 }
  0xd4   :  { %v87_v18 = vpop.permute.xlu1 %86 }
  0xd5   :  { %v159_v19 = vpop.permute.xlu0 %158  ;;  %vm103_vm1 = vcmp.eq.s32.totalorder %v937_v32, %v87_v18 }
  0xd6   :  { %vm191_vm9 = vcmp.eq.s32.totalorder %v937_v32, %v159_v19 }
  0xd7   :  { %vm207_vm2 = vmor %vm95_vm15, %vm191_vm9 }
  0xd8   :  { %v183_v20 = vpop.permute.xlu1 %182 }
  0xd9   :  { %v268_v21 = vpop.permute.xlu0 %267  ;;  %vm199_vm12 = vcmp.eq.s32.totalorder %v937_v32, %v183_v20 }
  0xda   :  { %vm302_vm10 = vcmp.eq.s32.totalorder %v937_v32, %v268_v21  ;;  %vm215_vm3 = vmor %vm103_vm1, %vm199_vm12 }
  0xdb   :  { %vm318_vm13 = vmor %vm206_vm7, %vm302_vm10 }
  0xdc   :  { %v292_v22 = vpop.permute.xlu1 %291  ;;  %v602_v23 = vsel %vm318_vm13, 1.0, %v741_v38 }
  0xdd   :  { %vm310_vm14 = vcmp.eq.s32.totalorder %v937_v32, %v292_v22  ;;  %v271_v25 = vpop.permute.xlu0 %270  ;;  %672 = vmatprep.mubr.msk.f32.mxu0 %vm366_vm11, %v602_v23 }
  0xde   :  { %vm326_vm0 = vmor %vm214_vm8, %vm310_vm14  ;;  %vm303_vm4 = vcmp.eq.s32.totalorder %v937_v32, %v271_v25 }
  0xdf   :  { %v610_v24 = vsel %vm326_vm0, 1.0, %v741_v38  ;;  %vm319_vm5 = vmor %vm207_vm2, %vm303_vm4 }
  0xe0   :  { %v295_v26 = vpop.permute.xlu1 %294  ;;  %684 = vmatprep.mubr.msk.f32.mxu1 %vm366_vm11, %v610_v24  ;;  %v603_v27 = vsel %vm319_vm5, 1.0, %v741_v38 }
  0xe1   :  { %vm311_vm6 = vcmp.eq.s32.totalorder %v937_v32, %v295_v26  ;;  %673 = vmatmul.mubr.msk.f32.gmra.mrb[6].mxu0 %vm366_vm11, %v603_v27 }
  0xe2   :  { %vm327_vm7 = vmor %vm215_vm3, %vm311_vm6 }
  0xe3   :  { %v611_v28 = vsel %vm327_vm7, 1.0, %v741_v38 }
  0xe4   :  { %685 = vmatmul.mubr.msk.f32.gmra.mrb[6].mxu1 %vm366_vm11, %v611_v28 }
 0x16c   :  { %v665_v29 = vpop.f32.mrb[0].mxu0 }
 0x16d   :  { %565 = vst [vmem:[#allocation3 + $0x8] sm:$0xff] %v665_v29  ;;  %v485_v30 = vpop.f32.mrb[1].mxu0 }
 0x16e   :  { %564 = vst [vmem:[#allocation3] sm:$0xff] %v485_v30 }
 0x16f   :  { %v677_v31 = vpop.f32.mrb[0].mxu1 }
 0x170   :  { %573 = vst [vmem:[#allocation3 + $0x48] sm:$0xff] %v677_v31  ;;  %v525_v33 = vpop.f32.mrb[1].mxu1 }
 0x171   :  { %572 = vst [vmem:[#allocation3 + $0x40] sm:$0xff] %v525_v33 }
 0x184   :  { %v668_v34 = vpop.f32.mrb[2].mxu0 }
 0x185   :  { %567 = vst [vmem:[#allocation3 + $0x18] sm:$0xff] %v668_v34  ;;  %v495_v32 = vpop.f32.mrb[3].mxu0 }
 0x186   :  { %566 = vst [vmem:[#allocation3 + $0x10] sm:$0xff] %v495_v32 }
 0x187   :  { %v680_v35 = vpop.f32.mrb[2].mxu1 }
 0x188   :  { %575 = vst [vmem:[#allocation3 + $0x58] sm:$0xff] %v680_v35  ;;  %v535_v36 = vpop.f32.mrb[3].mxu1 }
 0x189   :  { %574 = vst [vmem:[#allocation3 + $0x50] sm:$0xff] %v535_v36 }
 0x19c   :  { %v671_v37 = vpop.f32.mrb[4].mxu0 }
 0x19d   :  { %569 = vst [vmem:[#allocation3 + $0x28] sm:$0xff] %v671_v37  ;;  %v505_v38 = vpop.f32.mrb[5].mxu0 }
 0x19e   :  { %568 = vst [vmem:[#allocation3 + $0x20] sm:$0xff] %v505_v38 }
 0x19f   :  { %v683_v39 = vpop.f32.mrb[4].mxu1 }
 0x1a0   :  { %577 = vst [vmem:[#allocation3 + $0x68] sm:$0xff] %v683_v39  ;;  %v545_v40 = vpop.f32.mrb[5].mxu1 }
 0x1a1   :  { %576 = vst [vmem:[#allocation3 + $0x60] sm:$0xff] %v545_v40 }
 0x1b4   :  { %v674_v41 = vpop.f32.mrb[6].mxu0 }
 0x1b5   :  { %571 = vst [vmem:[#allocation3 + $0x38] sm:$0xff] %v674_v41  ;;  %v515_v42 = vpop.f32.mrb[7].mxu0 }
 0x1b6   :  { %570 = vst [vmem:[#allocation3 + $0x30] sm:$0xff] %v515_v42 }
 0x1b7   :  { %v686_v43 = vpop.f32.mrb[6].mxu1 }
 0x1b8   :  { %579 = vst [vmem:[#allocation3 + $0x78] sm:$0xff] %v686_v43  ;;  %v555_v44 = vpop.f32.mrb[7].mxu1 }
 0x1b9   :  { %578 = vst [vmem:[#allocation3 + $0x70] sm:$0xff] %v555_v44 }
 0x1ba   :  { %726 = shalt.err (!%p723_p4)
}
 0x1bb   :  { %s727_s21 = scalar_lea.hbm %s1036_s5, 2048 }
 0x1bc   :  { %p728_p5 = scmp.ne.s32.totalorder %s1036_s5, %s727_s21  ;;  %p731_p6 = scmp.lt.u32.totalorder %s727_s21, %s1036_s5 }
 0x1be   :  { %p733_p7 = pnand %p731_p6, %p728_p5 }
 0x1c0   :  { %736 = shalt.err (!%p733_p7)
}
 0x1c1   :  { %s743_s25 = smov 128   ;;  %s744_s26 = smov 8  }
 0x1c2   :  { %591 = dma.vmem_to_hbm [thread:$0]  %s586_s17, 2048, %s1036_s5, [#allocation4], %s743_s25, %s743_s25, %s744_s26  }
 0x1c3   :  { %737 = dma.done.wait [#allocation4], 2048  }
 0x1c4   :  { %738 = vsyncadd [#allocation4], 4294965248 }
 0x1c5   :  { %595 = vsyncpa [#allocation4], 1 }

</bundles_post_ra>
